<compile_context>
chip_gen: v5e
topology: v5e:2x2
jax: 0.10.0
libtpu: 0.0.40
codegen_flags: <defaults>
</compile_context>

<pallas_src>
import jax
import jax.numpy as jnp
from jax.experimental import pallas as pl
from jax.experimental.pallas import tpu as pltpu

LANE = 128
SUBLANE = 8
NEG_MASK = -1e30            # finite "minus infinity" for padded logit columns
MiB = 1024 * 1024


# --------------------------------------------------------------------------
# small helpers
# --------------------------------------------------------------------------
def _round_up(v, m):
    return ((v + m - 1) // m) * m


def _pad2(a, rows, cols):
    r, c = a.shape
    return jnp.pad(a, ((0, rows - r), (0, cols - c)))


def _pick_tile(n):
    """Largest tile in {1024,512,256,128} that still gives >= 2 row blocks."""
    for t in (1024, 512, 256, 128):
        if n >= 2 * t:
            return t
    return 128


def _compiler_params(dimension_semantics, bytes_needed):
    # Budget-driven scoped-VMEM limit (double-buffered streamed tiles + scratch
    # + headroom), capped at 48 MiB so it fits every generation (v7x: 64 MiB).
    limit = int(min(48 * MiB, max(16 * MiB, 2 * bytes_needed)))
    return pltpu.CompilerParams(
        dimension_semantics=dimension_semantics, vmem_limit_bytes=limit)


# --------------------------------------------------------------------------
# kernels
# --------------------------------------------------------------------------
def fused_gcn_kernel(a_ref, x_ref, w1_ref, b1_ref, w2_ref, b2_ref, out_ref):
    """Whole forward for small graphs: everything VMEM-resident, one launch.

    b2_ref carries -1e30 on padded logit columns (mask folded into the bias).
    """
    xw1 = jnp.dot(x_ref[...], w1_ref[...], preferred_element_type=jnp.float32)
    h = jnp.maximum(
        jnp.dot(a_ref[...], xw1.astype(jnp.bfloat16),
                preferred_element_type=jnp.float32) + b1_ref[...], 0.0)
    hw2 = jnp.dot(h.astype(jnp.bfloat16), w2_ref[...],
                  preferred_element_type=jnp.float32)
    z = jnp.dot(a_ref[...], hw2.astype(jnp.bfloat16),
                preferred_element_type=jnp.float32) + b2_ref[...]
    z_max = jnp.max(z, axis=1, keepdims=True)
    zs = z - z_max
    lse = jnp.log(jnp.sum(jnp.exp(zs), axis=1, keepdims=True))
    out_ref[...] = zs - lse


def feat_transform_kernel(x_ref, w_ref, out_ref):
    """out = x_block @ W1  (bf16 MXU inputs, f32 accumulation, bf16 output)."""
    out_ref[...] = jnp.dot(
        x_ref[...], w_ref[...], preferred_element_type=jnp.float32
    ).astype(jnp.bfloat16)


def agg1_relu_matmul_kernel(a_ref, xw_ref, b1_ref, w2_ref, out_ref, acc_ref):
    """K-tiled: acc += A_blk @ XW1_blk; last k: out = (relu(acc+b1) @ W2) bf16."""
    @pl.when(pl.program_id(1) == 0)
    def _():
        acc_ref[...] = jnp.zeros_like(acc_ref)

    acc_ref[...] += jnp.dot(a_ref[...], xw_ref[...],
                            preferred_element_type=jnp.float32)

    @pl.when(pl.program_id(1) == pl.num_programs(1) - 1)
    def _():
        h = jnp.maximum(acc_ref[...] + b1_ref[...], 0.0).astype(jnp.bfloat16)
        out_ref[...] = jnp.dot(
            h, w2_ref[...], preferred_element_type=jnp.float32
        ).astype(jnp.bfloat16)


def agg2_logsoftmax_kernel(a_ref, hw_ref, b2_ref, out_ref, acc_ref):
    """K-tiled: acc += A_blk @ HW2_blk; last k: out = log_softmax(acc + b2)."""
    @pl.when(pl.program_id(1) == 0)
    def _():
        acc_ref[...] = jnp.zeros_like(acc_ref)

    acc_ref[...] += jnp.dot(a_ref[...], hw_ref[...],
                            preferred_element_type=jnp.float32)

    @pl.when(pl.program_id(1) == pl.num_programs(1) - 1)
    def _():
        z = acc_ref[...] + b2_ref[...]            # padded cols masked via b2
        z_max = jnp.max(z, axis=1, keepdims=True)
        zs = z - z_max
        lse = jnp.log(jnp.sum(jnp.exp(zs), axis=1, keepdims=True))
        out_ref[...] = zs - lse


# --------------------------------------------------------------------------
# pallas_call wrappers
# --------------------------------------------------------------------------
def _gcn_fused_small(a_bf16, x_bf16, w1_bf16, b1_f32, w2_bf16, b2_m_f32,
                     bytes_needed):
    n_pad = a_bf16.shape[0]
    op = w2_bf16.shape[1]
    return pl.pallas_call(
        fused_gcn_kernel,
        out_shape=jax.ShapeDtypeStruct((n_pad, op), jnp.float32),
        compiler_params=_compiler_params(None, bytes_needed),
    )(a_bf16, x_bf16, w1_bf16, b1_f32, w2_bf16, b2_m_f32)


def _feat_transform(x_bf16, w_bf16, tm):
    n, kin = x_bf16.shape
    fp = w_bf16.shape[1]
    tile_bytes = 2 * (tm * kin * 2 + tm * fp * 2) + kin * fp * 2
    return pl.pallas_call(
        feat_transform_kernel,
        out_shape=jax.ShapeDtypeStruct((n, fp), jnp.bfloat16),
        grid_spec=pltpu.PrefetchScalarGridSpec(
            num_scalar_prefetch=0,
            grid=(n // tm,),
            in_specs=[
                pl.BlockSpec((tm, kin), lambda i: (i, 0)),
                pl.BlockSpec((kin, fp), lambda i: (0, 0)),
            ],
            out_specs=pl.BlockSpec((tm, fp), lambda i: (i, 0)),
        ),
        compiler_params=_compiler_params(("parallel",), tile_bytes),
    )(x_bf16, w_bf16)


def _aggregate_relu_matmul(a_bf16, xw_bf16, b1_f32, w2_bf16, tm, tk):
    """hw2 = (relu(A @ XW1 + b1)) @ W2, K-tiled, fused second transform."""
    n = a_bf16.shape[0]
    hp = xw_bf16.shape[1]
    op = w2_bf16.shape[1]
    tile_bytes = (2 * (tm * tk * 2 + tk * hp * 2 + tm * op * 2)
                  + tm * hp * 4 + hp * op * 2 + hp * 4)
    return pl.pallas_call(
        agg1_relu_matmul_kernel,
        out_shape=jax.ShapeDtypeStruct((n, op), jnp.bfloat16),
        grid_spec=pltpu.PrefetchScalarGridSpec(
            num_scalar_prefetch=0,
            grid=(n // tm, n // tk),
            in_specs=[
                pl.BlockSpec((tm, tk), lambda i, k: (i, k)),   # streamed A
                pl.BlockSpec((tk, hp), lambda i, k: (k, 0)),   # streamed XW1
                pl.BlockSpec((1, hp), lambda i, k: (0, 0)),    # bias (tiny)
                pl.BlockSpec((hp, op), lambda i, k: (0, 0)),   # W2 (32 KiB)
            ],
            out_specs=pl.BlockSpec((tm, op), lambda i, k: (i, 0)),
            scratch_shapes=[pltpu.VMEM((tm, hp), jnp.float32)],
        ),
        compiler_params=_compiler_params(("parallel", "arbitrary"), tile_bytes),
    )(a_bf16, xw_bf16, b1_f32, w2_bf16)


def _aggregate_logsoftmax(a_bf16, hw_bf16, b2_m_f32, tm, tk):
    """out = log_softmax(A @ HW2 + b2), K-tiled; mask comes in through b2."""
    n = a_bf16.shape[0]
    op = hw_bf16.shape[1]
    tile_bytes = (2 * (tm * tk * 2 + tk * op * 2 + tm * op * 4)
                  + tm * op * 4 + op * 4)
    return pl.pallas_call(
        agg2_logsoftmax_kernel,
        out_shape=jax.ShapeDtypeStruct((n, op), jnp.float32),
        grid_spec=pltpu.PrefetchScalarGridSpec(
            num_scalar_prefetch=0,
            grid=(n // tm, n // tk),
            in_specs=[
                pl.BlockSpec((tm, tk), lambda i, k: (i, k)),   # streamed A
                pl.BlockSpec((tk, op), lambda i, k: (k, 0)),   # streamed HW2
                pl.BlockSpec((1, op), lambda i, k: (0, 0)),    # masked bias
            ],
            out_specs=pl.BlockSpec((tm, op), lambda i, k: (i, 0)),
            scratch_shapes=[pltpu.VMEM((tm, op), jnp.float32)],
        ),
        compiler_params=_compiler_params(("parallel", "arbitrary"), tile_bytes),
    )(a_bf16, hw_bf16, b2_m_f32)


# --------------------------------------------------------------------------
# full forward
# --------------------------------------------------------------------------
def gcn_forward(a_hat_bf16, x, w1, b1, w2, b2, force_tiled=False):
    n, dim_in = x.shape
    dim_h = w1.shape[1]
    dim_out = w2.shape[1]
    in_p = _round_up(dim_in, LANE)   # lane-dense padded widths
    hp = _round_up(dim_h, LANE)
    op = _round_up(dim_out, LANE)

    # Parameters (padded, bf16 MXU operands; biases stay f32 for the epilogue).
    w1_p = _pad2(w1, in_p, hp).astype(jnp.bfloat16)
    w2_p = _pad2(w2, hp, op).astype(jnp.bfloat16)
    b1_p = _pad2(b1.astype(jnp.float32), 1, hp)
    # Fold the padded-logit mask into b2: padded HW2 columns are exactly 0,
    # so acc + (-1e30) masks them; -1e30 (finite) avoids inf-inf NaNs.
    b2_m = jnp.full((1, op), NEG_MASK, jnp.float32)
    b2_m = b2_m.at[:, :dim_out].set(b2.astype(jnp.float32))

    # --- small-graph path: one fused pallas_call, A read from HBM once -------
    n8 = _round_up(n, SUBLANE)
    fused_bytes = (n8 * n8 * 2 + n8 * in_p * 2 + n8 * op * 4
                   + 4 * n8 * max(hp, op) * 4            # f32 intermediates
                   + (in_p * hp + hp * op) * 2 + (hp + op) * 4)
    if not force_tiled and fused_bytes <= 20 * MiB:
        a_p = _pad2(a_hat_bf16, n8, n8)
        x_p = _pad2(x.astype(jnp.bfloat16), n8, in_p)
        out_pad = _gcn_fused_small(a_p, x_p, w1_p, b1_p, w2_p, b2_m,
                                   fused_bytes)
        return out_pad[:n, :dim_out]

    # --- large-graph path: row/K-tiled kernels --------------------------------
    tm = _pick_tile(n)
    tk = tm
    n_pad = _round_up(n, tm)                      # never a single (N, N) block
    a_p = _pad2(a_hat_bf16, n_pad, n_pad)
    x_p = _pad2(x.astype(jnp.bfloat16), n_pad, in_p)

    # layer 1: X @ W1 computed once, then fused aggregate+relu+(@W2)
    xw1 = _feat_transform(x_p, w1_p, tm)                       # (n_pad, hp) bf16
    hw2 = _aggregate_relu_matmul(a_p, xw1, b1_p, w2_p, tm, tk)  # (n_pad, op) bf16

    # layer 2: aggregate + bias(+mask) + log_softmax
    out_pad = _aggregate_logsoftmax(a_p, hw2, b2_m, tm, tk)     # (n_pad, op) f32
    return out_pad[:n, :dim_out]


# --------------------------------------------------------------------------
# glue: normalized adjacency from edge_index (plain JAX, not a kernel)
# --------------------------------------------------------------------------
def build_norm_adj(edge_index, num_nodes):
    """Dense D^{-1/2} (A + I) D^{-1/2} from a (2, E) edge_index, in bf16."""
    src, dst = edge_index[0], edge_index[1]
    a = jnp.zeros((num_nodes, num_nodes), jnp.float32)
    a = a.at[dst, src].add(1.0)                   # duplicate edges are summed
    diag = jnp.diagonal(a)
    a = a + jnp.diag(jnp.where(diag == 0.0, 1.0, 0.0))   # add_remaining_self_loops
    deg = a.sum(axis=1)
    d_inv_sqrt = jnp.where(deg > 0, 1.0 / jnp.sqrt(deg), 0.0)
    a_norm = d_inv_sqrt[:, None] * a * d_inv_sqrt[None, :]
    return a_norm.astype(jnp.bfloat16)            # bf16 halves the O(N^2) stream


def glorot(key, shape):
    fan_in, fan_out = shape
    limit = jnp.sqrt(6.0 / (fan_in + fan_out))
    return jax.random.uniform(key, shape, jnp.float32, -limit, limit)


# --------------------------------------------------------------------------
# main
# --------------------------------------------------------------------------
if __name__ == "__main__":
    key = jax.random.PRNGKey(0)

    def make_case(k, n, e, dim_in, dim_h, dim_out):
        k_x, k_e1, k_e2, k_w1, k_w2 = jax.random.split(k, 5)
        x = jax.random.normal(k_x, (n, dim_in), jnp.float32)
        src = jax.random.randint(k_e1, (e,), 0, n)
        dst = jax.random.randint(k_e2, (e,), 0, n)
        edge_index = jnp.stack([src, dst], axis=0)       # (2, E), like PyG
        w1 = glorot(k_w1, (dim_in, dim_h))
        b1 = jnp.zeros((1, dim_h), jnp.float32)
        w2 = glorot(k_w2, (dim_h, dim_out))
        b2 = jnp.zeros((1, dim_out), jnp.float32)
        return x, edge_index, w1, b1, w2, b2

    def reference(a_bf16, x, w1, b1, w2, b2):
        a = a_bf16.astype(jnp.float32)
        h = jnp.maximum(a @ (x @ w1) + b1, 0.0)
        z = a @ (h @ w2) + b2
        return jax.nn.log_softmax(z, axis=1)

    k1, k2 = jax.random.split(key)

    # case 1: toy graph (N=128) -> single fused pallas_call, all VMEM-resident
    x, ei, w1, b1, w2, b2 = make_case(k1, 128, 512, 64, 32, 8)
    a_hat = build_norm_adj(ei, 128)
    out = jax.block_until_ready(gcn_forward(a_hat, x, w1, b1, w2, b2))
    assert out.shape == (128, 8)
    assert bool(jnp.all(jnp.abs(jnp.exp(out).sum(axis=1) - 1.0) < 1e-4))
    assert bool(jnp.max(jnp.abs(out - reference(a_hat, x, w1, b1, w2, b2))) < 0.25)

    # case 2: odd-sized graph (N=300) -> tiled path (K-tiled aggregations,
    # padded to a multiple of the 128 tile, 3x3 grid, fused h@W2 epilogue)
    x, ei, w1, b1, w2, b2 = make_case(k2, 300, 1500, 64, 32, 8)
    a_hat = build_norm_adj(ei, 300)
    out = jax.block_until_ready(
        gcn_forward(a_hat, x, w1, b1, w2, b2, force_tiled=True))
    assert out.shape == (300, 8)
    assert bool(jnp.all(jnp.abs(jnp.exp(out).sum(axis=1) - 1.0) < 1e-4))
    assert bool(jnp.max(jnp.abs(out - reference(a_hat, x, w1, b1, w2, b2))) < 0.25)

    # TODO(synk): F.dropout(p=0.5) only acts in training; inference forward
    # treats it as identity (could be added with pltpu.prng_* if needed).
    print("KERNEL_OK")
</pallas_src>

<mosaic_0001>
module attributes {stable_mosaic.version = 11 : i64} {
  func.func @fused_gcn_kernel(%arg0: memref<128x128xbf16, #tpu.memory_space<vmem>>, %arg1: memref<128x128xbf16, #tpu.memory_space<vmem>>, %arg2: memref<128x128xbf16, #tpu.memory_space<vmem>>, %arg3: memref<1x128xf32, #tpu.memory_space<vmem>>, %arg4: memref<128x128xbf16, #tpu.memory_space<vmem>>, %arg5: memref<1x128xf32, #tpu.memory_space<vmem>>, %arg6: memref<128x128xf32, #tpu.memory_space<vmem>>) attributes {dimension_semantics = [], scalar_prefetch = 0 : i64, scratch_operands = 0 : i64, tpu.core_type = #tpu.core_type<tc>} {
    %c0 = arith.constant 0 : index
    %c0_0 = arith.constant 0 : index
    %0 = vector.load %arg1[%c0, %c0_0] : memref<128x128xbf16, #tpu.memory_space<vmem>>, vector<128x128xbf16>
    %c0_1 = arith.constant 0 : index
    %c0_2 = arith.constant 0 : index
    %1 = vector.load %arg2[%c0_1, %c0_2] : memref<128x128xbf16, #tpu.memory_space<vmem>>, vector<128x128xbf16>
    %cst = arith.constant dense<0.000000e+00> : vector<128x128xf32>
    %2 = tpu.matmul %0, %1, %cst {dimension_numbers = #tpu.dot_dimension_numbers<[1], [0], [0], [1], [0, 0, 1, 1], [], []>} : vector<128x128xbf16>, vector<128x128xbf16>, vector<128x128xf32> -> vector<128x128xf32>
    %c0_3 = arith.constant 0 : index
    %c0_4 = arith.constant 0 : index
    %3 = vector.load %arg0[%c0_3, %c0_4] : memref<128x128xbf16, #tpu.memory_space<vmem>>, vector<128x128xbf16>
    %4 = arith.truncf %2 : vector<128x128xf32> to vector<128x128xbf16>
    %cst_5 = arith.constant dense<0.000000e+00> : vector<128x128xf32>
    %5 = tpu.matmul %3, %4, %cst_5 {dimension_numbers = #tpu.dot_dimension_numbers<[1], [0], [0], [1], [0, 0, 1, 1], [], []>} : vector<128x128xbf16>, vector<128x128xbf16>, vector<128x128xf32> -> vector<128x128xf32>
    %c0_6 = arith.constant 0 : index
    %c0_7 = arith.constant 0 : index
    %6 = vector.load %arg3[%c0_6, %c0_7] : memref<1x128xf32, #tpu.memory_space<vmem>>, vector<1x128xf32>
    %7 = vector.broadcast %6 : vector<1x128xf32> to vector<128x128xf32>
    %8 = arith.addf %5, %7 : vector<128x128xf32>
    %cst_8 = arith.constant 0.000000e+00 : f32
    %9 = vector.broadcast %cst_8 : f32 to vector<128x128xf32>
    %10 = arith.maximumf %8, %9 : vector<128x128xf32>
    %11 = arith.truncf %10 : vector<128x128xf32> to vector<128x128xbf16>
    %c0_9 = arith.constant 0 : index
    %c0_10 = arith.constant 0 : index
    %12 = vector.load %arg4[%c0_9, %c0_10] : memref<128x128xbf16, #tpu.memory_space<vmem>>, vector<128x128xbf16>
    %cst_11 = arith.constant dense<0.000000e+00> : vector<128x128xf32>
    %13 = tpu.matmul %11, %12, %cst_11 {dimension_numbers = #tpu.dot_dimension_numbers<[1], [0], [0], [1], [0, 0, 1, 1], [], []>} : vector<128x128xbf16>, vector<128x128xbf16>, vector<128x128xf32> -> vector<128x128xf32>
    %c0_12 = arith.constant 0 : index
    %c0_13 = arith.constant 0 : index
    %14 = vector.load %arg0[%c0_12, %c0_13] : memref<128x128xbf16, #tpu.memory_space<vmem>>, vector<128x128xbf16>
    %15 = arith.truncf %13 : vector<128x128xf32> to vector<128x128xbf16>
    %cst_14 = arith.constant dense<0.000000e+00> : vector<128x128xf32>
    %16 = tpu.matmul %14, %15, %cst_14 {dimension_numbers = #tpu.dot_dimension_numbers<[1], [0], [0], [1], [0, 0, 1, 1], [], []>} : vector<128x128xbf16>, vector<128x128xbf16>, vector<128x128xf32> -> vector<128x128xf32>
    %c0_15 = arith.constant 0 : index
    %c0_16 = arith.constant 0 : index
    %17 = vector.load %arg5[%c0_15, %c0_16] : memref<1x128xf32, #tpu.memory_space<vmem>>, vector<1x128xf32>
    %18 = vector.broadcast %17 : vector<1x128xf32> to vector<128x128xf32>
    %19 = arith.addf %16, %18 : vector<128x128xf32>
    %cst_17 = arith.constant dense<0xFF800000> : vector<128xf32>
    %20 = vector.multi_reduction <maximumf>, %19, %cst_17 [1] : vector<128x128xf32> to vector<128xf32>
    %21 = vector.shape_cast %20 : vector<128xf32> to vector<128x1xf32>
    %22 = vector.broadcast %21 : vector<128x1xf32> to vector<128x128xf32>
    %23 = arith.subf %19, %22 : vector<128x128xf32>
    %24 = math.exp %23 : vector<128x128xf32>
    %cst_18 = arith.constant dense<0.000000e+00> : vector<128xf32>
    %25 = vector.multi_reduction <add>, %24, %cst_18 [1] : vector<128x128xf32> to vector<128xf32>
    %26 = vector.shape_cast %25 : vector<128xf32> to vector<128x1xf32>
    %27 = math.log %26 : vector<128x1xf32>
    %28 = vector.broadcast %27 : vector<128x1xf32> to vector<128x128xf32>
    %29 = arith.subf %23, %28 : vector<128x128xf32>
    %c0_19 = arith.constant 0 : index
    %c0_20 = arith.constant 0 : index
    %30 = vector.load %arg6[%c0_19, %c0_20] : memref<128x128xf32, #tpu.memory_space<vmem>>, vector<128x128xf32>
    tpu.vector_store %arg6[%c0_19, %c0_20], %29 {strides = array<i32>} : memref<128x128xf32, #tpu.memory_space<vmem>>, vector<128x128xf32>,
    return
  }
}

</mosaic_0001>

<bundles_post_ra>
// kernel: tpu_custom_call.1
= control target key start
LH: loop header
LB: loop body
LE: loop exit
PB: predicated region body
PF: predicated region fallthrough
CT: control target
= control target key end

     0   :  { %11 = vsyncpa [#allocation3], 0  ;;  %s1348_s0 = inlined_call_operand.hbm [shape: bf16[128,128], index: 0, kind: input, shape index: {}]   ;;  %s1349_s1 = inlined_call_operand.hbm [shape: bf16[128,128], index: 1, kind: input, shape index: {}]   ;;  %s1350_s2 = inlined_call_operand.hbm [shape: bf16[128,128], index: 2, kind: input, shape index: {}]   ;;  %s1351_s3 = inlined_call_operand.vmem [shape: f32[1,128], index: 3, kind: input, shape index: {}]   ;;  %s1352_s4 = inlined_call_operand.hbm [shape: bf16[128,128], index: 4, kind: input, shape index: {}]   ;;  %s1353_s5 = inlined_call_operand.vmem [shape: f32[1,128], index: 5, kind: input, shape index: {}]   ;;  %s1354_s6 = inlined_call_operand.hbm [shape: f32[128,128], index: 6, kind: output, shape index: {}]  }
   0x1   :  { %12 = vsyncpa [#allocation6], 0 }
   0x2   :  { %13 = vsyncpa [#allocation9], 0 }
   0x3   :  { %14 = vsyncpa [#allocation4], 0  ;;  %s32_s23 = sshll.u32 %s1349_s1, 4  ;;  %s1147_s24 = smov [#allocation5]   ;;  %s33_s23 = int_to_ptr.hbm [resolvable:$true] %s32_s23 }
   0x4   :  { %s34_s25 = sshll.u32 %s1147_s24, 4  ;;  %s19_s28 = sshll.u32 %s1348_s0, 4  ;;  %s35_s25 = int_to_ptr.vmem [resolvable:$true] %s34_s25  ;;  %s20_s28 = int_to_ptr.hbm [resolvable:$true] %s19_s28 }
   0x5   :  { %s1148_s29 = smov 64   ;;  %s1149_s30 = smov 4  }
   0x6   :  { %40 = dma.hbm_to_vmem [thread:$0]  %s33_s23, 1024, %s35_s25, [#allocation6], %s1148_s29, %s1148_s29, %s1149_s30  }
   0x7   :  { %s1150_s7 = smov [#allocation2]   ;;  %s45_s11 = sshll.u32 %s1350_s2, 4  ;;  %s46_s11 = int_to_ptr.hbm [resolvable:$true] %s45_s11 }
   0x8   :  { %s21_s8 = sshll.u32 %s1150_s7, 4  ;;  %s60_s13 = sshll.u32 %s1352_s4, 4  ;;  %s22_s8 = int_to_ptr.vmem [resolvable:$true] %s21_s8  ;;  %s61_s13 = int_to_ptr.hbm [resolvable:$true] %s60_s13 }
   0x9   :  { %27 = dma.hbm_to_vmem [thread:$0]  %s20_s28, 1024, %s22_s8, [#allocation3], %s1148_s29, %s1148_s29, %s1149_s30  }
   0xa   :  { %s1151_s14 = smov [#allocation7]   ;;  %s1152_s0 = smov [#allocation8]  }
   0xb   :  { %s47_s15 = sshll.u32 %s1151_s14, 4  ;;  %s62_s16 = sshll.u32 %s1152_s0, 4  ;;  %s48_s15 = int_to_ptr.vmem [resolvable:$true] %s47_s15  ;;  %s63_s16 = int_to_ptr.vmem [resolvable:$true] %s62_s16 }
   0xc   :  { %53 = dma.hbm_to_vmem [thread:$0]  %s46_s11, 1024, %s48_s15, [#allocation6], %s1148_s29, %s1148_s29, %s1149_s30  }
   0xd   :  { %68 = dma.hbm_to_vmem [thread:$0]  %s61_s13, 1024, %s63_s16, [#allocation9], %s1148_s29, %s1148_s29, %s1149_s30  }
   0xe   :  { %1139 = dma.done.wait [#allocation3], 1024  }
   0xf   :  { %1140 = vsyncadd [#allocation3], 4294966272 }
  0x10   :  { %1141 = dma.done.wait [#allocation6], 2048  }
  0x11   :  { %1142 = vsyncadd [#allocation6], 4294965248 }
  0x12   :  { %1143 = dma.done.wait [#allocation9], 1024  }
  0x13   :  { %1144 = vsyncadd [#allocation9], 4294966272  ;;  %v927_v0 = vld [vmem:[#allocation7 + $0x38] sm:$0xff]  ;;  %v926_v1 = vld [vmem:[#allocation7 + $0x30] sm:$0xff]  ;;  %s769_s21 = sshll.u32 %s1354_s6, 4  ;;  %s1154_s22 = smov 128   ;;  %s770_s21 = int_to_ptr.hbm [resolvable:$true] %s769_s21 }
  0x14   :  { %215 = vmatpush.bf16.msra.mxu0 %v927_v0  ;;  %v925_v2 = vld [vmem:[#allocation7 + $0x28] sm:$0xff]  ;;  %v924_v3 = vld [vmem:[#allocation7 + $0x20] sm:$0xff]  ;;  %v923_v4 = vld [vmem:[#allocation7 + $0x18] sm:$0xff]  ;;  %s1155_s23 = smov 8  }
  0x15   :  { %v922_v5 = vld [vmem:[#allocation7 + $0x10] sm:$0xff]  ;;  %v921_v6 = vld [vmem:[#allocation7 + $0x8] sm:$0xff]  ;;  %v920_v7 = vld [vmem:[#allocation7] sm:$0xff] }
  0x16   :  { %v912_v8 = vld [vmem:[#allocation5] sm:$0xff]  ;;  %v913_v9 = vld [vmem:[#allocation5 + $0x8] sm:$0xff]  ;;  %v914_v10 = vld [vmem:[#allocation5 + $0x10] sm:$0xff] }
  0x17   :  { %v915_v11 = vld [vmem:[#allocation5 + $0x18] sm:$0xff]  ;;  %v916_v12 = vld [vmem:[#allocation5 + $0x20] sm:$0xff]  ;;  %v917_v13 = vld [vmem:[#allocation5 + $0x28] sm:$0xff] }
  0x18   :  { %216 = vmatpush.bf16.msra.mxu0 %v926_v1  ;;  %v918_v14 = vld [vmem:[#allocation5 + $0x30] sm:$0xff]  ;;  %v919_v15 = vld [vmem:[#allocation5 + $0x38] sm:$0xff]  ;;  %v1203_v40 = vld [vmem:[#allocation2] sm:$0xff] }
  0x19   :  { %v1206_v41 = vld [vmem:[#allocation2 + $0x8] sm:$0xff]  ;;  %v1209_v42 = vld [vmem:[#allocation2 + $0x10] sm:$0xff]  ;;  %v1212_v43 = vld [vmem:[#allocation2 + $0x18] sm:$0xff] }
  0x1a   :  { %v1215_v44 = vld [vmem:[#allocation2 + $0x20] sm:$0xff]  ;;  %v943_v45 = vld [vmem:[#allocation8 + $0x38] sm:$0xff]  ;;  %v1218_v46 = vld [vmem:[#allocation2 + $0x28] sm:$0xff] }
  0x1b   :  { %477 = vmatpush.bf16.msra.mxu2 %v943_v45  ;;  %v942_v47 = vld [vmem:[#allocation8 + $0x30] sm:$0xff]  ;;  %v941_v48 = vld [vmem:[#allocation8 + $0x28] sm:$0xff]  ;;  %v940_v49 = vld [vmem:[#allocation8 + $0x20] sm:$0xff] }
  0x1c   :  { %217 = vmatpush.bf16.msra.mxu0 %v925_v2  ;;  %v939_v50 = vld [vmem:[#allocation8 + $0x18] sm:$0xff]  ;;  %v1221_v51 = vld [vmem:[#allocation2 + $0x30] sm:$0xff]  ;;  %v937_v53 = vld [vmem:[#allocation8 + $0x8] sm:$0xff] }
  0x1d   :  { %v938_v52 = vld [vmem:[#allocation8 + $0x10] sm:$0xff]  ;;  %v936_v54 = vld [vmem:[#allocation8] sm:$0xff]  ;;  %v1224_v55 = vld [vmem:[#allocation2 + $0x38] sm:$0xff] }
  0x1e   :  { %v953_v57 = vld [vmem:[%s1351_s3] ss:$0 sm:$0xff] }
  0x1f   :  { %478 = vmatpush.bf16.msra.mxu2 %v942_v47 }
  0x20   :  { %218 = vmatpush.bf16.msra.mxu0 %v924_v3 }
  0x23   :  { %479 = vmatpush.bf16.msra.mxu2 %v941_v48 }
  0x24   :  { %219 = vmatpush.bf16.msra.mxu0 %v923_v4 }
  0x27   :  { %480 = vmatpush.bf16.msra.mxu2 %v940_v49 }
  0x28   :  { %220 = vmatpush.bf16.msra.mxu0 %v922_v5 }
  0x2b   :  { %481 = vmatpush.bf16.msra.mxu2 %v939_v50 }
  0x2c   :  { %221 = vmatpush.bf16.msra.mxu0 %v921_v6 }
  0x2f   :  { %482 = vmatpush.bf16.msra.mxu2 %v938_v52 }
  0x30   :  { %222 = vmatpush.bf16.msra.mxu0 %v920_v7 }
  0x33   :  { %223 = vmatmul.bf16.vlgmr.msra.gmra.mxu0 %v912_v8  ;;  %483 = vmatpush.bf16.msra.mxu2 %v937_v53 }
  0x37   :  { %484 = vmatpush.bf16.msra.mxu2 %v936_v54 }
  0x43   :  { %228 = vmatmul.bf16.gmra.mxu0 %v913_v9 }
  0x53   :  { %233 = vmatmul.bf16.gmra.mxu0 %v914_v10 }
  0x63   :  { %238 = vmatmul.bf16.gmra.mxu0 %v915_v11 }
  0x73   :  { %243 = vmatmul.bf16.gmra.mxu0 %v916_v12 }
  0x83   :  { %248 = vmatmul.bf16.gmra.mxu0 %v917_v13 }
  0x93   :  { %253 = vmatmul.bf16.gmra.mxu0 %v918_v14 }
  0xa3   :  { %258 = vmatmul.bf16.gmra.mxu0 %v919_v15 }
  0xb0   :  { %v224_v16 = vpop.f32.mrf.mxu0 }
  0xb8   :  { %v226_v17 = vpop.f32.mrf.mxu0 }
  0xb9   :  { %v280_v18 = vpack.c.bf16 %v226_v17, %v224_v16 }
  0xc0   :  { %v229_v19 = vpop.f32.mrf.mxu0 }
  0xc8   :  { %v231_v20 = vpop.f32.mrf.mxu0 }
  0xc9   :  { %v281_v21 = vpack.c.bf16 %v231_v20, %v229_v19 }
  0xd0   :  { %v234_v22 = vpop.f32.mrf.mxu0 }
  0xd8   :  { %v236_v23 = vpop.f32.mrf.mxu0 }
  0xd9   :  { %v282_v24 = vpack.c.bf16 %v236_v23, %v234_v22 }
  0xe0   :  { %v239_v25 = vpop.f32.mrf.mxu0 }
  0xe8   :  { %v241_v26 = vpop.f32.mrf.mxu0 }
  0xe9   :  { %v283_v27 = vpack.c.bf16 %v241_v26, %v239_v25 }
  0xf0   :  { %v244_v28 = vpop.f32.mrf.mxu0 }
  0xf8   :  { %v246_v29 = vpop.f32.mrf.mxu0 }
  0xf9   :  { %v284_v39 = vpack.c.bf16 %v246_v29, %v244_v28 }
 0x100   :  { %v249_v30 = vpop.f32.mrf.mxu0 }
 0x108   :  { %v251_v31 = vpop.f32.mrf.mxu0 }
 0x109   :  { %v285_v38 = vpack.c.bf16 %v251_v31, %v249_v30 }
 0x110   :  { %v254_v32 = vpop.f32.mrf.mxu0 }
 0x118   :  { %v256_v33 = vpop.f32.mrf.mxu0 }
 0x119   :  { %v286_v37 = vpack.c.bf16 %v256_v33, %v254_v32 }
 0x120   :  { %v259_v34 = vpop.f32.mrf.mxu0 }
 0x128   :  { %v261_v35 = vpop.f32.mrf.mxu0 }
 0x129   :  { %v287_v36 = vpack.c.bf16 %v261_v35, %v259_v34 }
 0x12b   :  { %340 = vmatpush.bf16.msra.mxu1 %v287_v36 }
 0x12f   :  { %341 = vmatpush.bf16.msra.mxu1 %v286_v37 }
 0x133   :  { %342 = vmatpush.bf16.msra.mxu1 %v285_v38 }
 0x137   :  { %343 = vmatpush.bf16.msra.mxu1 %v284_v39 }
 0x13b   :  { %344 = vmatpush.bf16.msra.mxu1 %v283_v27 }
 0x13f   :  { %345 = vmatpush.bf16.msra.mxu1 %v282_v24 }
 0x143   :  { %346 = vmatpush.bf16.msra.mxu1 %v281_v21 }
 0x147   :  { %347 = vmatpush.bf16.msra.mxu1 %v280_v18 }
 0x14a   :  { %348 = vmatmul.bf16.vlgmr.msra.gmra.mxu1 %v1203_v40 }
 0x15a   :  { %353 = vmatmul.bf16.gmra.mxu1 %v1206_v41 }
 0x16a   :  { %358 = vmatmul.bf16.gmra.mxu1 %v1209_v42 }
 0x17a   :  { %363 = vmatmul.bf16.gmra.mxu1 %v1212_v43 }
 0x18a   :  { %368 = vmatmul.bf16.gmra.mxu1 %v1215_v44 }
 0x19a   :  { %373 = vmatmul.bf16.gmra.mxu1 %v1218_v46 }
 0x1aa   :  { %378 = vmatmul.bf16.gmra.mxu1 %v1221_v51 }
 0x1ba   :  { %383 = vmatmul.bf16.gmra.mxu1 %v1224_v55 }
 0x1c7   :  { %v349_v56 = vpop.f32.mrf.mxu1 }
 0x1c8   :  { %v350_v58 = vadd.f32 %v953_v57, %v349_v56 }
 0x1ca   :  { %v389_v61 = vmax.f32 %v350_v58, 0.0 }
 0x1cf   :  { %v351_v59 = vpop.f32.mrf.mxu1 }
 0x1d0   :  { %v352_v60 = vadd.f32 %v953_v57, %v351_v59 }
 0x1d2   :  { %v390_v62 = vmax.f32 %v352_v60, 0.0 }
 0x1d4   :  { %v405_v63 = vpack.c.bf16 %v390_v62, %v389_v61 }
 0x1d6   :  { %485 = vmatmul.bf16.vlgmr.msra.gmra.mxu2 %v405_v63 }
 0x1d7   :  { %v354_v0 = vpop.f32.mrf.mxu1 }
 0x1d8   :  { %v355_v1 = vadd.f32 %v953_v57, %v354_v0 }
 0x1da   :  { %v391_v4 = vmax.f32 %v355_v1, 0.0 }
 0x1df   :  { %v356_v2 = vpop.f32.mrf.mxu1 }
 0x1e0   :  { %v357_v3 = vadd.f32 %v953_v57, %v356_v2 }
 0x1e2   :  { %v392_v5 = vmax.f32 %v357_v3, 0.0 }
 0x1e4   :  { %v406_v6 = vpack.c.bf16 %v392_v5, %v391_v4 }
 0x1e6   :  { %490 = vmatmul.bf16.gmra.mxu2 %v406_v6 }
 0x1e7   :  { %v359_v7 = vpop.f32.mrf.mxu1 }
 0x1e8   :  { %v360_v8 = vadd.f32 %v953_v57, %v359_v7 }
 0x1ea   :  { %v393_v11 = vmax.f32 %v360_v8, 0.0 }
 0x1ef   :  { %v361_v9 = vpop.f32.mrf.mxu1 }
 0x1f0   :  { %v362_v10 = vadd.f32 %v953_v57, %v361_v9 }
 0x1f2   :  { %v394_v12 = vmax.f32 %v362_v10, 0.0 }
 0x1f4   :  { %v407_v13 = vpack.c.bf16 %v394_v12, %v393_v11 }
 0x1f6   :  { %495 = vmatmul.bf16.gmra.mxu2 %v407_v13 }
 0x1f7   :  { %v364_v14 = vpop.f32.mrf.mxu1 }
 0x1f8   :  { %v365_v15 = vadd.f32 %v953_v57, %v364_v14 }
 0x1fa   :  { %v395_v18 = vmax.f32 %v365_v15, 0.0 }
 0x1ff   :  { %v366_v16 = vpop.f32.mrf.mxu1 }
 0x200   :  { %v367_v17 = vadd.f32 %v953_v57, %v366_v16 }
 0x202   :  { %v396_v19 = vmax.f32 %v367_v17, 0.0  ;;  %v954_v17 = vld [vmem:[%s1353_s5] ss:$0 sm:$0xff]  ;;  %s1153_s5 = smov [#allocation10]  }
 0x203   :  { %s767_s18 = sshll.u32 %s1153_s5, 4  ;;  %s768_s18 = int_to_ptr.vmem [resolvable:$true] %s767_s18 }
 0x204   :  { %v408_v20 = vpack.c.bf16 %v396_v19, %v395_v18 }
 0x206   :  { %500 = vmatmul.bf16.gmra.mxu2 %v408_v20 }
 0x207   :  { %v369_v21 = vpop.f32.mrf.mxu1 }
 0x208   :  { %v370_v22 = vadd.f32 %v953_v57, %v369_v21 }
 0x20a   :  { %v397_v25 = vmax.f32 %v370_v22, 0.0 }
 0x20f   :  { %v371_v23 = vpop.f32.mrf.mxu1 }
 0x210   :  { %v372_v24 = vadd.f32 %v953_v57, %v371_v23 }
 0x212   :  { %v398_v26 = vmax.f32 %v372_v24, 0.0 }
 0x214   :  { %v409_v27 = vpack.c.bf16 %v398_v26, %v397_v25 }
 0x216   :  { %505 = vmatmul.bf16.gmra.mxu2 %v409_v27 }
 0x217   :  { %v374_v28 = vpop.f32.mrf.mxu1 }
 0x218   :  { %v375_v29 = vadd.f32 %v953_v57, %v374_v28 }
 0x21a   :  { %v399_v32 = vmax.f32 %v375_v29, 0.0 }
 0x21f   :  { %v376_v30 = vpop.f32.mrf.mxu1 }
 0x220   :  { %v377_v31 = vadd.f32 %v953_v57, %v376_v30 }
 0x222   :  { %v400_v33 = vmax.f32 %v377_v31, 0.0 }
 0x224   :  { %v410_v34 = vpack.c.bf16 %v400_v33, %v399_v32 }
 0x226   :  { %510 = vmatmul.bf16.gmra.mxu2 %v410_v34 }
 0x227   :  { %v379_v35 = vpop.f32.mrf.mxu1 }
 0x228   :  { %v380_v36 = vadd.f32 %v953_v57, %v379_v35 }
 0x22a   :  { %v401_v39 = vmax.f32 %v380_v36, 0.0 }
 0x22f   :  { %v381_v37 = vpop.f32.mrf.mxu1 }
 0x230   :  { %v382_v38 = vadd.f32 %v953_v57, %v381_v37 }
 0x232   :  { %v402_v45 = vmax.f32 %v382_v38, 0.0 }
 0x234   :  { %v411_v47 = vpack.c.bf16 %v402_v45, %v401_v39 }
 0x236   :  { %515 = vmatmul.bf16.gmra.mxu2 %v411_v47 }
 0x237   :  { %v384_v48 = vpop.f32.mrf.mxu1 }
 0x238   :  { %v385_v49 = vadd.f32 %v953_v57, %v384_v48 }
 0x23a   :  { %v403_v53 = vmax.f32 %v385_v49, 0.0 }
 0x23f   :  { %v386_v50 = vpop.f32.mrf.mxu1 }
 0x240   :  { %v387_v52 = vadd.f32 %v953_v57, %v386_v50 }
 0x242   :  { %v404_v54 = vmax.f32 %v387_v52, 0.0 }
 0x244   :  { %v412_v56 = vpack.c.bf16 %v404_v54, %v403_v53 }
 0x246   :  { %520 = vmatmul.bf16.gmra.mxu2 %v412_v56 }
 0x259   :  { %v486_v58 = vpop.f32.mrf.mxu2 }
 0x261   :  { %v488_v59 = vpop.f32.mrf.mxu2 }
 0x262   :  { %v526_v60 = vpack.c.bf16 %v488_v59, %v486_v58 }
 0x269   :  { %v491_v61 = vpop.f32.mrf.mxu2 }
 0x271   :  { %v493_v62 = vpop.f32.mrf.mxu2 }
 0x272   :  { %v527_v63 = vpack.c.bf16 %v493_v62, %v491_v61 }
 0x279   :  { %v496_v0 = vpop.f32.mrf.mxu2 }
 0x281   :  { %v498_v1 = vpop.f32.mrf.mxu2 }
 0x282   :  { %v528_v2 = vpack.c.bf16 %v498_v1, %v496_v0 }
 0x289   :  { %v501_v3 = vpop.f32.mrf.mxu2 }
 0x291   :  { %v503_v4 = vpop.f32.mrf.mxu2 }
 0x292   :  { %v529_v5 = vpack.c.bf16 %v503_v4, %v501_v3 }
 0x299   :  { %v506_v6 = vpop.f32.mrf.mxu2 }
 0x2a1   :  { %v508_v7 = vpop.f32.mrf.mxu2 }
 0x2a2   :  { %v530_v16 = vpack.c.bf16 %v508_v7, %v506_v6 }
 0x2a9   :  { %v511_v8 = vpop.f32.mrf.mxu2 }
 0x2b1   :  { %v513_v57 = vpop.f32.mrf.mxu2 }
 0x2b2   :  { %v531_v15 = vpack.c.bf16 %v513_v57, %v511_v8 }
 0x2b9   :  { %v516_v9 = vpop.f32.mrf.mxu2 }
 0x2c1   :  { %v518_v10 = vpop.f32.mrf.mxu2 }
 0x2c2   :  { %v532_v14 = vpack.c.bf16 %v518_v10, %v516_v9 }
 0x2c9   :  { %v521_v11 = vpop.f32.mrf.mxu2 }
 0x2d1   :  { %v523_v12 = vpop.f32.mrf.mxu2 }
 0x2d2   :  { %v533_v13 = vpack.c.bf16 %v523_v12, %v521_v11 }
 0x2d4   :  { %538 = vmatpush.bf16.msra.mxu3 %v533_v13 }
 0x2d8   :  { %539 = vmatpush.bf16.msra.mxu3 %v532_v14 }
 0x2dc   :  { %540 = vmatpush.bf16.msra.mxu3 %v531_v15 }
 0x2e0   :  { %541 = vmatpush.bf16.msra.mxu3 %v530_v16 }
 0x2e4   :  { %542 = vmatpush.bf16.msra.mxu3 %v529_v5 }
 0x2e8   :  { %543 = vmatpush.bf16.msra.mxu3 %v528_v2 }
 0x2ec   :  { %544 = vmatpush.bf16.msra.mxu3 %v527_v63 }
 0x2f0   :  { %545 = vmatpush.bf16.msra.mxu3 %v526_v60 }
 0x2f3   :  { %546 = vmatmul.bf16.vlgmr.msra.gmra.mxu3 %v1203_v40 }
 0x303   :  { %551 = vmatmul.bf16.gmra.mxu3 %v1206_v41 }
 0x313   :  { %556 = vmatmul.bf16.gmra.mxu3 %v1209_v42 }
 0x323   :  { %561 = vmatmul.bf16.gmra.mxu3 %v1212_v43 }
 0x333   :  { %566 = vmatmul.bf16.gmra.mxu3 %v1215_v44 }
 0x343   :  { %571 = vmatmul.bf16.gmra.mxu3 %v1218_v46 }
 0x353   :  { %576 = vmatmul.bf16.gmra.mxu3 %v1221_v51 }
 0x363   :  { %581 = vmatmul.bf16.gmra.mxu3 %v1224_v55 }
 0x376   :  { %v547_v18 = vpop.f32.mrf.mxu3 }
 0x377   :  { %v548_v40 = vadd.f32 %v954_v17, %v547_v18 }
 0x379   :  { %587 = vmax.xlane.f32.xlu0 %v548_v40 }
 0x37e   :  { %v549_v41 = vpop.f32.mrf.mxu3 }
 0x37f   :  { %v550_v19 = vadd.f32 %v954_v17, %v549_v41 }
 0x381   :  { %589 = vmax.xlane.f32.xlu0 %v550_v19 }
 0x386   :  { %v552_v42 = vpop.f32.mrf.mxu3 }
 0x387   :  { %v553_v43 = vadd.f32 %v954_v17, %v552_v42 }
 0x389   :  { %591 = vmax.xlane.f32.xlu1 %v553_v43 }
 0x38e   :  { %v554_v44 = vpop.f32.mrf.mxu3 }
 0x38f   :  { %v555_v20 = vadd.f32 %v954_v17, %v554_v44 }
 0x391   :  { %593 = vmax.xlane.f32.xlu1 %v555_v20 }
 0x396   :  { %v557_v46 = vpop.f32.mrf.mxu3 }
 0x397   :  { %v558_v51 = vadd.f32 %v954_v17, %v557_v46 }
 0x399   :  { %595 = vmax.xlane.f32.xlu2 %v558_v51 }
 0x39e   :  { %v559_v55 = vpop.f32.mrf.mxu3 }
 0x39f   :  { %v560_v21 = vadd.f32 %v954_v17, %v559_v55 }
 0x3a1   :  { %597 = vmax.xlane.f32.xlu2 %v560_v21 }
 0x3a6   :  { %v562_v22 = vpop.f32.mrf.mxu3 }
 0x3a7   :  { %v1241_v23 = vadd.f32 %v954_v17, %v562_v22 }
 0x3a9   :  { %599 = vmax.xlane.f32.xlu0 %v1241_v23 }
 0x3ae   :  { %v564_v24 = vpop.f32.mrf.mxu3 }
 0x3af   :  { %v1244_v25 = vadd.f32 %v954_v17, %v564_v24 }
 0x3b1   :  { %601 = vmax.xlane.f32.xlu1 %v1244_v25 }
 0x3b6   :  { %v567_v26 = vpop.f32.mrf.mxu3 }
 0x3b7   :  { %v1247_v27 = vadd.f32 %v954_v17, %v567_v26 }
 0x3b9   :  { %603 = vmax.xlane.f32.xlu2 %v1247_v27 }
 0x3be   :  { %v569_v28 = vpop.f32.mrf.mxu3 }
 0x3bf   :  { %v1250_v29 = vadd.f32 %v954_v17, %v569_v28 }
 0x3c1   :  { %605 = vmax.xlane.f32.xlu0 %v1250_v29 }
 0x3c6   :  { %v572_v30 = vpop.f32.mrf.mxu3 }
 0x3c7   :  { %v1253_v31 = vadd.f32 %v954_v17, %v572_v30 }
 0x3c9   :  { %607 = vmax.xlane.f32.xlu1 %v1253_v31 }
 0x3ce   :  { %v574_v32 = vpop.f32.mrf.mxu3 }
 0x3cf   :  { %v1256_v33 = vadd.f32 %v954_v17, %v574_v32 }
 0x3d1   :  { %609 = vmax.xlane.f32.xlu2 %v1256_v33 }
 0x3d6   :  { %v577_v34 = vpop.f32.mrf.mxu3 }
 0x3d7   :  { %v1259_v35 = vadd.f32 %v954_v17, %v577_v34 }
 0x3d9   :  { %611 = vmax.xlane.f32.xlu0 %v1259_v35 }
 0x3de   :  { %v579_v36 = vpop.f32.mrf.mxu3 }
 0x3df   :  { %v1262_v37 = vadd.f32 %v954_v17, %v579_v36 }
 0x3e1   :  { %613 = vmax.xlane.f32.xlu1 %v1262_v37 }
 0x3e6   :  { %v582_v38 = vpop.f32.mrf.mxu3 }
 0x3e7   :  { %v1265_v39 = vadd.f32 %v954_v17, %v582_v38 }
 0x3e9   :  { %615 = vmax.xlane.f32.xlu2 %v1265_v39 }
 0x3ec   :  { %v588_v45 = vpop.xlane.xlu0 %587 }
 0x3ed   :  { %v1268_v47 = vsub.f32 %v548_v40, %v588_v45 }
 0x3ee   :  { %v584_v48 = vpop.f32.mrf.mxu3 }
 0x3ef   :  { %v635_v49 = vmul.f32 1.442695, %v1268_v47  ;;  %v1271_v50 = vadd.f32 %v954_v17, %v584_v48 }
 0x3f1   :  { %955 = vpow2.f32 %v635_v49  ;;  %617 = vmax.xlane.f32.xlu0 %v1271_v50 }
 0x3f4   :  { %v590_v52 = vpop.xlane.xlu0 %589 }
 0x3f5   :  { %v1274_v53 = vsub.f32 %v550_v19, %v590_v52 }
 0x3f7   :  { %v956_v54 = vpop.eup %955  ;;  %v637_v56 = vmul.f32 1.442695, %v1274_v53 }
 0x3f8   :  { %667 = vadd.xlane.f32.xlu1 %v956_v54 }
 0x3f9   :  { %957 = vpow2.f32 %v637_v56 }
 0x3fc   :  { %v592_v58 = vpop.xlane.xlu1 %591 }
 0x3fd   :  { %v1277_v59 = vsub.f32 %v553_v43, %v592_v58 }
 0x3ff   :  { %v958_v60 = vpop.eup %957  ;;  %v639_v61 = vmul.f32 1.442695, %v1277_v59 }
 0x400   :  { %669 = vadd.xlane.f32.xlu2 %v958_v60 }
 0x401   :  { %959 = vpow2.f32 %v639_v61 }
 0x404   :  { %v594_v62 = vpop.xlane.xlu1 %593 }
 0x405   :  { %v1280_v63 = vsub.f32 %v555_v20, %v594_v62 }
 0x407   :  { %v960_v0 = vpop.eup %959  ;;  %v641_v1 = vmul.f32 1.442695, %v1280_v63 }
 0x408   :  { %671 = vadd.xlane.f32.xlu0 %v960_v0 }
 0x409   :  { %961 = vpow2.f32 %v641_v1 }
 0x40c   :  { %v596_v2 = vpop.xlane.xlu2 %595 }
 0x40d   :  { %v1283_v3 = vsub.f32 %v558_v51, %v596_v2 }
 0x40f   :  { %v962_v4 = vpop.eup %961  ;;  %v643_v5 = vmul.f32 1.442695, %v1283_v3 }
 0x410   :  { %673 = vadd.xlane.f32.xlu1 %v962_v4 }
 0x411   :  { %963 = vpow2.f32 %v643_v5 }
 0x414   :  { %v598_v6 = vpop.xlane.xlu2 %597 }
 0x415   :  { %v1286_v7 = vsub.f32 %v560_v21, %v598_v6 }
 0x417   :  { %v964_v8 = vpop.eup %963  ;;  %v645_v57 = vmul.f32 1.442695, %v1286_v7 }
 0x418   :  { %675 = vadd.xlane.f32.xlu2 %v964_v8 }
 0x419   :  { %965 = vpow2.f32 %v645_v57 }
 0x41c   :  { %v600_v9 = vpop.xlane.xlu0 %599 }
 0x41d   :  { %v1290_v10 = vsub.f32 %v1241_v23, %v600_v9 }
 0x41f   :  { %v966_v11 = vpop.eup %965  ;;  %v647_v12 = vmul.f32 1.442695, %v1290_v10 }
 0x420   :  { %677 = vadd.xlane.f32.xlu0 %v966_v11 }
 0x421   :  { %967 = vpow2.f32 %v647_v12 }
 0x424   :  { %v602_v13 = vpop.xlane.xlu1 %601 }
 0x425   :  { %v1294_v14 = vsub.f32 %v1244_v25, %v602_v13 }
 0x427   :  { %v968_v15 = vpop.eup %967  ;;  %v649_v16 = vmul.f32 1.442695, %v1294_v14 }
 0x428   :  { %679 = vadd.xlane.f32.xlu1 %v968_v15 }
 0x429   :  { %969 = vpow2.f32 %v649_v16 }
 0x42c   :  { %v604_v17 = vpop.xlane.xlu2 %603 }
 0x42d   :  { %v1298_v18 = vsub.f32 %v1247_v27, %v604_v17 }
 0x42f   :  { %v970_v40 = vpop.eup %969  ;;  %v651_v41 = vmul.f32 1.442695, %v1298_v18 }
 0x430   :  { %681 = vadd.xlane.f32.xlu2 %v970_v40 }
 0x431   :  { %971 = vpow2.f32 %v651_v41 }
 0x434   :  { %v606_v19 = vpop.xlane.xlu0 %605 }
 0x435   :  { %v1302_v42 = vsub.f32 %v1250_v29, %v606_v19 }
 0x437   :  { %v972_v43 = vpop.eup %971  ;;  %v653_v44 = vmul.f32 1.442695, %v1302_v42 }
 0x438   :  { %683 = vadd.xlane.f32.xlu0 %v972_v43 }
 0x439   :  { %973 = vpow2.f32 %v653_v44 }
 0x43c   :  { %v608_v20 = vpop.xlane.xlu1 %607 }
 0x43d   :  { %v1306_v46 = vsub.f32 %v1253_v31, %v608_v20 }
 0x43f   :  { %v974_v51 = vpop.eup %973  ;;  %v655_v55 = vmul.f32 1.442695, %v1306_v46 }
 0x440   :  { %685 = vadd.xlane.f32.xlu1 %v974_v51 }
 0x441   :  { %975 = vpow2.f32 %v655_v55 }
 0x444   :  { %v610_v21 = vpop.xlane.xlu2 %609 }
 0x445   :  { %v1310_v22 = vsub.f32 %v1256_v33, %v610_v21 }
 0x447   :  { %v976_v23 = vpop.eup %975  ;;  %v657_v24 = vmul.f32 1.442695, %v1310_v22 }
 0x448   :  { %687 = vadd.xlane.f32.xlu2 %v976_v23 }
 0x449   :  { %977 = vpow2.f32 %v657_v24 }
 0x44c   :  { %v612_v25 = vpop.xlane.xlu0 %611 }
 0x44d   :  { %v1314_v26 = vsub.f32 %v1259_v35, %v612_v25 }
 0x44f   :  { %v978_v27 = vpop.eup %977  ;;  %v659_v28 = vmul.f32 1.442695, %v1314_v26 }
 0x450   :  { %689 = vadd.xlane.f32.xlu0 %v978_v27 }
 0x451   :  { %979 = vpow2.f32 %v659_v28 }
 0x454   :  { %v614_v29 = vpop.xlane.xlu1 %613 }
 0x455   :  { %v1318_v30 = vsub.f32 %v1262_v37, %v614_v29 }
 0x457   :  { %v980_v31 = vpop.eup %979  ;;  %v661_v32 = vmul.f32 1.442695, %v1318_v30 }
 0x458   :  { %691 = vadd.xlane.f32.xlu1 %v980_v31 }
 0x459   :  { %981 = vpow2.f32 %v661_v32 }
 0x45c   :  { %v616_v33 = vpop.xlane.xlu2 %615 }
 0x45d   :  { %v1322_v34 = vsub.f32 %v1265_v39, %v616_v33 }
 0x45f   :  { %v982_v35 = vpop.eup %981  ;;  %v663_v36 = vmul.f32 1.442695, %v1322_v34 }
 0x460   :  { %693 = vadd.xlane.f32.xlu2 %v982_v35 }
 0x461   :  { %983 = vpow2.f32 %v663_v36 }
 0x464   :  { %v618_v38 = vpop.xlane.xlu0 %617 }
 0x465   :  { %v1326_v45 = vsub.f32 %v1271_v50, %v618_v38 }
 0x467   :  { %v984_v37 = vpop.eup %983  ;;  %v665_v48 = vmul.f32 1.442695, %v1326_v45 }
 0x468   :  { %695 = vadd.xlane.f32.xlu0 %v984_v37 }
 0x469   :  { %985 = vpow2.f32 %v665_v48 }
 0x46b   :  { %v668_v49 = vpop.xlane.xlu1 %667 }
 0x46c   :  { %987 = vlog2.f32 %v668_v49 }
 0x46f   :  { %v986_v52 = vpop.eup %985 }
 0x470   :  { %697 = vadd.xlane.f32.xlu1 %v986_v52 }
 0x472   :  { %v988_v39 = vpop.eup %987 }
 0x473   :  { %v700_v54 = vmul.f32 0.6931472, %v988_v39  ;;  %v670_v56 = vpop.xlane.xlu2 %669 }
 0x474   :  { %989 = vlog2.f32 %v670_v56 }
 0x475   :  { %v731_v58 = vsub.f32 %v1268_v47, %v700_v54 }
 0x477   :  { %747 = vst [vmem:[#allocation10] sm:$0xff] %v731_v58 }
 0x47a   :  { %v990_v60 = vpop.eup %989 }
 0x47b   :  { %v702_v61 = vmul.f32 0.6931472, %v990_v60  ;;  %v672_v50 = vpop.xlane.xlu0 %671 }
 0x47c   :  { %991 = vlog2.f32 %v672_v50 }
 0x47d   :  { %v732_v62 = vsub.f32 %v1274_v53, %v702_v61 }
 0x47f   :  { %748 = vst [vmem:[#allocation10 + $0x8] sm:$0xff] %v732_v62 }
 0x482   :  { %v992_v0 = vpop.eup %991 }
 0x483   :  { %v704_v1 = vmul.f32 0.6931472, %v992_v0  ;;  %v674_v2 = vpop.xlane.xlu1 %673 }
 0x484   :  { %993 = vlog2.f32 %v674_v2 }
 0x485   :  { %v733_v4 = vsub.f32 %v1277_v59, %v704_v1 }
 0x487   :  { %749 = vst [vmem:[#allocation10 + $0x10] sm:$0xff] %v733_v4 }
 0x48a   :  { %v994_v5 = vpop.eup %993 }
 0x48b   :  { %v706_v6 = vmul.f32 0.6931472, %v994_v5  ;;  %v676_v8 = vpop.xlane.xlu2 %675 }
 0x48c   :  { %995 = vlog2.f32 %v676_v8 }
 0x48d   :  { %v734_v47 = vsub.f32 %v1280_v63, %v706_v6 }
 0x48f   :  { %750 = vst [vmem:[#allocation10 + $0x18] sm:$0xff] %v734_v47 }
 0x492   :  { %v996_v57 = vpop.eup %995 }
 0x493   :  { %v708_v9 = vmul.f32 0.6931472, %v996_v57  ;;  %v678_v11 = vpop.xlane.xlu0 %677 }
 0x494   :  { %997 = vlog2.f32 %v678_v11 }
 0x495   :  { %v735_v53 = vsub.f32 %v1283_v3, %v708_v9 }
 0x497   :  { %751 = vst [vmem:[#allocation10 + $0x20] sm:$0xff] %v735_v53 }
 0x49a   :  { %v998_v12 = vpop.eup %997 }
 0x49b   :  { %v710_v13 = vmul.f32 0.6931472, %v998_v12  ;;  %v680_v15 = vpop.xlane.xlu1 %679 }
 0x49c   :  { %999 = vlog2.f32 %v680_v15 }
 0x49d   :  { %v736_v59 = vsub.f32 %v1286_v7, %v710_v13 }
 0x49f   :  { %752 = vst [vmem:[#allocation10 + $0x28] sm:$0xff] %v736_v59 }
 0x4a2   :  { %v1000_v16 = vpop.eup %999 }
 0x4a3   :  { %v712_v17 = vmul.f32 0.6931472, %v1000_v16  ;;  %v682_v40 = vpop.xlane.xlu2 %681 }
 0x4a4   :  { %1001 = vlog2.f32 %v682_v40 }
 0x4a5   :  { %v737_v63 = vsub.f32 %v1290_v10, %v712_v17 }
 0x4a7   :  { %753 = vst [vmem:[#allocation10 + $0x30] sm:$0xff] %v737_v63 }
 0x4aa   :  { %v1002_v41 = vpop.eup %1001 }
 0x4ab   :  { %v714_v19 = vmul.f32 0.6931472, %v1002_v41  ;;  %v684_v43 = vpop.xlane.xlu0 %683 }
 0x4ac   :  { %1003 = vlog2.f32 %v684_v43 }
 0x4ad   :  { %v738_v3 = vsub.f32 %v1294_v14, %v714_v19 }
 0x4af   :  { %754 = vst [vmem:[#allocation10 + $0x38] sm:$0xff] %v738_v3 }
 0x4b2   :  { %v1004_v44 = vpop.eup %1003 }
 0x4b3   :  { %v716_v20 = vmul.f32 0.6931472, %v1004_v44  ;;  %v686_v51 = vpop.xlane.xlu1 %685 }
 0x4b4   :  { %1005 = vlog2.f32 %v686_v51 }
 0x4b5   :  { %v739_v7 = vsub.f32 %v1298_v18, %v716_v20 }
 0x4b7   :  { %755 = vst [vmem:[#allocation10 + $0x40] sm:$0xff] %v739_v7 }
 0x4ba   :  { %v1006_v55 = vpop.eup %1005 }
 0x4bb   :  { %v718_v21 = vmul.f32 0.6931472, %v1006_v55  ;;  %v688_v23 = vpop.xlane.xlu2 %687 }
 0x4bc   :  { %1007 = vlog2.f32 %v688_v23 }
 0x4bd   :  { %v740_v10 = vsub.f32 %v1302_v42, %v718_v21 }
 0x4bf   :  { %756 = vst [vmem:[#allocation10 + $0x48] sm:$0xff] %v740_v10 }
 0x4c2   :  { %v1008_v24 = vpop.eup %1007 }
 0x4c3   :  { %v720_v25 = vmul.f32 0.6931472, %v1008_v24  ;;  %v690_v27 = vpop.xlane.xlu0 %689 }
 0x4c4   :  { %1009 = vlog2.f32 %v690_v27 }
 0x4c5   :  { %v741_v14 = vsub.f32 %v1306_v46, %v720_v25 }
 0x4c7   :  { %757 = vst [vmem:[#allocation10 + $0x50] sm:$0xff] %v741_v14 }
 0x4ca   :  { %v1010_v28 = vpop.eup %1009 }
 0x4cb   :  { %v722_v29 = vmul.f32 0.6931472, %v1010_v28  ;;  %v692_v31 = vpop.xlane.xlu1 %691 }
 0x4cc   :  { %1011 = vlog2.f32 %v692_v31 }
 0x4cd   :  { %v742_v18 = vsub.f32 %v1310_v22, %v722_v29 }
 0x4cf   :  { %758 = vst [vmem:[#allocation10 + $0x58] sm:$0xff] %v742_v18 }
 0x4d2   :  { %v1012_v32 = vpop.eup %1011 }
 0x4d3   :  { %v724_v33 = vmul.f32 0.6931472, %v1012_v32  ;;  %v694_v35 = vpop.xlane.xlu2 %693 }
 0x4d4   :  { %1013 = vlog2.f32 %v694_v35 }
 0x4d5   :  { %v743_v42 = vsub.f32 %v1314_v26, %v724_v33 }
 0x4d7   :  { %759 = vst [vmem:[#allocation10 + $0x60] sm:$0xff] %v743_v42 }
 0x4da   :  { %v1014_v36 = vpop.eup %1013 }
 0x4db   :  { %v726_v38 = vmul.f32 0.6931472, %v1014_v36  ;;  %v696_v37 = vpop.xlane.xlu0 %695 }
 0x4dc   :  { %1015 = vlog2.f32 %v696_v37 }
 0x4dd   :  { %v744_v46 = vsub.f32 %v1318_v30, %v726_v38 }
 0x4df   :  { %760 = vst [vmem:[#allocation10 + $0x68] sm:$0xff] %v744_v46 }
 0x4e2   :  { %v1016_v48 = vpop.eup %1015 }
 0x4e3   :  { %v728_v49 = vmul.f32 0.6931472, %v1016_v48  ;;  %v698_v52 = vpop.xlane.xlu1 %697 }
 0x4e4   :  { %1017 = vlog2.f32 %v698_v52 }
 0x4e5   :  { %v745_v22 = vsub.f32 %v1322_v34, %v728_v49 }
 0x4e7   :  { %761 = vst [vmem:[#allocation10 + $0x70] sm:$0xff] %v745_v22 }
 0x4ea   :  { %v1018_v26 = vpop.eup %1017 }
 0x4eb   :  { %v730_v39 = vmul.f32 0.6931472, %v1018_v26 }
 0x4ed   :  { %v746_v30 = vsub.f32 %v1326_v45, %v730_v39 }
 0x4ef   :  { %762 = vst [vmem:[#allocation10 + $0x78] sm:$0xff] %v746_v30 }
 0x4f0   :  { %775 = dma.vmem_to_hbm [thread:$0]  %s768_s18, 2048, %s770_s21, [#allocation4], %s1154_s22, %s1154_s22, %s1155_s23  }
 0x4f1   :  { %1145 = dma.done.wait [#allocation4], 2048  }
 0x4f2   :  { %1146 = vsyncadd [#allocation4], 4294965248 }
 0x4f3   :  { %780 = vsyncpa [#allocation3], 1 }
 0x4f4   :  { %781 = vsyncpa [#allocation6], 1 }
 0x4f5   :  { %782 = vsyncpa [#allocation9], 1 }
 0x4f6   :  { %783 = vsyncpa [#allocation4], 1 }

</bundles_post_ra>
